<compile_context>
chip_gen: v7x
topology: tpu7x:2x2x1
jax: 0.10.0
libtpu: 0.0.40
codegen_flags: <defaults>
</compile_context>

<pallas_src>
import functools

import jax
import jax.numpy as jnp
from jax.experimental import pallas as pl
from jax.experimental.pallas import tpu as pltpu

LANES = 128
ACC_ROWS_MAX = 1024                      # fixed accumulator height (0.5 MiB f32)
MAX_TILE_ROWS = 8192                     # sweep 4096-8192; 8192 default
VMEM_LIMIT_BYTES = 32 * 1024 * 1024      # usage ~16.5 MiB << 32 MiB on all gens


def _cdiv(a, b):
    return -(-a // b)


def _round_up(a, b):
    return _cdiv(a, b) * b


def _num_tensorcores_per_chip():
    """v7x has 2 TensorCores/chip; v5e/v6e have 1.  Heuristic on device kind."""
    try:
        kind = jax.devices()[0].device_kind.lower()
    except Exception:
        return 1
    return 2 if "7" in kind else 1


def _quad_error_kernel(x_ref, y_ref, out_ref, acc_ref, *,
                       tile_rows, acc_rows, tiles_per_split,
                       valid_rows, need_mask):
    c = pl.program_id(0)   # split / TensorCore index
    i = pl.program_id(1)   # tile within split ("arbitrary" reduction axis)
    num_chunks = tile_rows // acc_rows

    @pl.when(i == 0)
    def _():
        acc_ref[...] = jnp.zeros_like(acc_ref)

    tile_idx = c * tiles_per_split + i          # unclamped global tile id

    def accumulate(masked):
        for k in range(num_chunks):             # static, fully unrolled
            r0 = k * acc_rows
            d = (x_ref[pl.ds(r0, acc_rows), :].astype(jnp.float32)
                 - y_ref[pl.ds(r0, acc_rows), :].astype(jnp.float32))
            if masked:
                # int32 row ids; only overflows past 2^31 rows (~1 TiB of f32).
                row_ids = (tile_idx * tile_rows + r0
                           + jax.lax.broadcasted_iota(jnp.int32, (acc_rows, LANES), 0))
                d = jnp.where(row_ids < valid_rows, d, 0.0)
            acc_ref[...] += d * d               # pure VPU work, hidden under DMA

    if need_mask:
        # Only the last real tile and over-covering (clamped) tiles overhang
        # the valid rows; every other step runs the unmasked steady-state path.
        is_ragged = (tile_idx + 1) * tile_rows > valid_rows

        @pl.when(is_ragged)
        def _():
            accumulate(True)

        @pl.when(jnp.logical_not(is_ragged))
        def _():
            accumulate(False)
    else:
        accumulate(False)

    @pl.when(i == pl.num_programs(1) - 1)
    def _():
        # single cross-lane/sublane reduce per split; unscaled partial sum
        out_ref[0, 0] = jnp.sum(acc_ref[...])


def _as_slab(a):
    """Flatten to a lane-dense (rows, 128) slab in a kernel-streamable dtype.

    complex  -> interleaved (re, im) float32 (one fused stack pass)
    f32/bf16/f16 -> native dtype (upcast happens inside the kernel)
    other    -> float32
    """
    if jnp.iscomplexobj(a):
        # TODO(synk): one fused interleave pass remains (XLA has no zero-copy
        # complex->f32 bitcast and Mosaic refuses complex refs); revisit with
        # CompilerParams(allow_input_fusion=...) to fuse it into the input DMA.
        a = jnp.stack([jnp.real(a), jnp.imag(a)], axis=-1).astype(jnp.float32)
    elif a.dtype not in (jnp.float32, jnp.bfloat16, jnp.float16):
        # TODO(synk): float64 inputs are downcast to f32; PyTorch keeps f64.
        a = a.astype(jnp.float32)
    flat = a.reshape(-1)
    sublane_mult = 8 * (4 // max(1, flat.dtype.itemsize))   # 8 for f32, 16 for bf16/f16
    n = flat.shape[0]
    n_aligned = _round_up(n, sublane_mult * LANES)
    if n_aligned != n:
        # only unaligned sizes pay a pad copy; pad is identical for x and y
        flat = jnp.pad(flat, (0, n_aligned - n))
    return flat.reshape(n_aligned // LANES, LANES)


def cv_quad_error(x, y):
    """0.5 * sum(|x - y|^2) for complex (or real) x, y of identical shape."""
    assert x.shape == y.shape, "x and y must have the same shape"

    common = jnp.result_type(x.dtype, y.dtype)
    x_s = _as_slab(x.astype(common) if x.dtype != common else x)
    y_s = _as_slab(y.astype(common) if y.dtype != common else y)
    rows = x_s.shape[0]

    tile_rows = min(MAX_TILE_ROWS, rows)
    if tile_rows > ACC_ROWS_MAX:
        tile_rows -= tile_rows % ACC_ROWS_MAX    # tile = whole multiple of acc chunk
    acc_rows = min(ACC_ROWS_MAX, tile_rows)
    num_tiles = _cdiv(rows, tile_rows)

    num_cores = _num_tensorcores_per_chip()
    num_splits = 2 if (num_cores >= 2 and num_tiles >= 2) else 1
    tiles_per_split = _cdiv(num_tiles, num_splits)
    covered_rows = num_splits * tiles_per_split * tile_rows
    need_mask = covered_rows != rows

    def in_index_map(c, i):
        # clamp so over-covering blocks stay in bounds; the in-kernel mask
        # zeroes their contribution.
        return (jnp.minimum(c * tiles_per_split + i, num_tiles - 1), 0)

    # TODO(synk): if a DMA bubble remains at step boundaries on v7x, add
    # pipeline_mode=pl.Buffered(3) here (one extra tile of VMEM per input).
    in_spec = pl.BlockSpec((tile_rows, LANES), in_index_map)
    out_spec = pl.BlockSpec((1, 1), lambda c, i: (c, 0), memory_space=pltpu.SMEM)

    # CORE_PARALLEL actually shards the split axis across v7x's 2 TensorCores;
    # plain "parallel" on single-TC chips (where num_splits is 1 anyway).
    split_sem = (getattr(pltpu, "CORE_PARALLEL", "parallel")
                 if num_splits > 1 else "parallel")

    kernel = functools.partial(
        _quad_error_kernel,
        tile_rows=tile_rows,
        acc_rows=acc_rows,
        tiles_per_split=tiles_per_split,
        valid_rows=rows,
        need_mask=need_mask,
    )

    partials = pl.pallas_call(
        kernel,
        out_shape=jax.ShapeDtypeStruct((num_splits, 1), jnp.float32),
        grid_spec=pltpu.PrefetchScalarGridSpec(
            num_scalar_prefetch=0,
            grid=(num_splits, tiles_per_split),
            in_specs=[in_spec, in_spec],
            out_specs=out_spec,
            scratch_shapes=[pltpu.VMEM((acc_rows, LANES), jnp.float32)],
        ),
        compiler_params=pltpu.CompilerParams(
            dimension_semantics=(split_sem, "arbitrary"),
            vmem_limit_bytes=VMEM_LIMIT_BYTES,
        ),
    )(x_s, y_s)

    # hoisted 0.5 scale + partial-sum combine (one tiny op)
    return 0.5 * jnp.sum(partials)


if __name__ == "__main__":
    key = jax.random.PRNGKey(0)
    k1, k2, k3, k4 = jax.random.split(key, 4)

    shape = (2, 4, 16, 16)  # batch=2, channels=4, spatial=16x16 (NCHW-like)
    x = (jax.random.normal(k1, shape, dtype=jnp.float32)
         + 1j * jax.random.normal(k2, shape, dtype=jnp.float32)).astype(jnp.complex64)
    y = (jax.random.normal(k3, shape, dtype=jnp.float32)
         + 1j * jax.random.normal(k4, shape, dtype=jnp.float32)).astype(jnp.complex64)

    out = cv_quad_error(x, y)
    jax.block_until_ready(out)

    # reference check in plain JAX
    ref = 0.5 * jnp.sum(jnp.abs(x - y) ** 2)
    assert jnp.allclose(out, ref, rtol=1e-5, atol=1e-5), (out, ref)

    print("KERNEL_OK")
</pallas_src>

<mosaic_0001>
module attributes {stable_mosaic.version = 11 : i64} {
  func.func @_quad_error_kernel(%arg0: i32, %arg1: i32, %arg2: memref<32x128xf32, #tpu.memory_space<vmem>>, %arg3: memref<32x128xf32, #tpu.memory_space<vmem>>, %arg4: memref<1x1xf32, #tpu.memory_space<smem>>, %arg5: memref<32x128xf32, #tpu.memory_space<vmem>>) attributes {dimension_semantics = [#tpu.dimension_semantics<parallel>, #tpu.dimension_semantics<arbitrary>], iteration_bounds = array<i64: 1, 1>, scalar_prefetch = 0 : i64, scratch_operands = 1 : i64, tpu.core_type = #tpu.core_type<tc>, window_params = [{transform_indices = @transform_0, window_bounds = array<i64: 32, 128>}, {transform_indices = @transform_1, window_bounds = array<i64: 32, 128>}, {transform_indices = @transform_2, window_bounds = array<i64: 1, 1>}]} {
    %c0_i32 = arith.constant 0 : i32
    %0 = arith.cmpi eq, %arg1, %c0_i32 : i32
    %1 = arith.extui %0 : i1 to i32
    %c0_i32_0 = arith.constant 0 : i32
    %2 = arith.cmpi ne, %1, %c0_i32_0 : i32
    scf.if %2 {
      %cst = arith.constant 0.000000e+00 : f32
      %13 = vector.broadcast %cst : f32 to vector<32x128xf32>
      %c0_10 = arith.constant 0 : index
      %c0_11 = arith.constant 0 : index
      %14 = vector.load %arg5[%c0_10, %c0_11] : memref<32x128xf32, #tpu.memory_space<vmem>>, vector<32x128xf32>
      tpu.vector_store %arg5[%c0_10, %c0_11], %13 {strides = array<i32>} : memref<32x128xf32, #tpu.memory_space<vmem>>, vector<32x128xf32>,
    } else {
    }
    %c0 = arith.constant 0 : index
    %c0_1 = arith.constant 0 : index
    %3 = vector.load %arg2[%c0, %c0_1] : memref<32x128xf32, #tpu.memory_space<vmem>>, vector<32x128xf32>
    %c0_2 = arith.constant 0 : index
    %c0_3 = arith.constant 0 : index
    %4 = vector.load %arg3[%c0_2, %c0_3] : memref<32x128xf32, #tpu.memory_space<vmem>>, vector<32x128xf32>
    %5 = arith.subf %3, %4 : vector<32x128xf32>
    %c0_4 = arith.constant 0 : index
    %c0_5 = arith.constant 0 : index
    %6 = vector.load %arg5[%c0_4, %c0_5] : memref<32x128xf32, #tpu.memory_space<vmem>>, vector<32x128xf32>
    %7 = arith.mulf %5, %5 : vector<32x128xf32>
    %8 = arith.addf %6, %7 : vector<32x128xf32>
    %c0_6 = arith.constant 0 : index
    %c0_7 = arith.constant 0 : index
    %9 = vector.load %arg5[%c0_6, %c0_7] : memref<32x128xf32, #tpu.memory_space<vmem>>, vector<32x128xf32>
    tpu.vector_store %arg5[%c0_6, %c0_7], %8 {strides = array<i32>} : memref<32x128xf32, #tpu.memory_space<vmem>>, vector<32x128xf32>,
    %c0_i32_8 = arith.constant 0 : i32
    %10 = arith.cmpi eq, %arg1, %c0_i32_8 : i32
    %11 = arith.extui %10 : i1 to i32
    %c0_i32_9 = arith.constant 0 : i32
    %12 = arith.cmpi ne, %11, %c0_i32_9 : i32
    scf.if %12 {
      %c0_10 = arith.constant 0 : index
      %c0_11 = arith.constant 0 : index
      %13 = vector.load %arg5[%c0_10, %c0_11] : memref<32x128xf32, #tpu.memory_space<vmem>>, vector<32x128xf32>
      %14 = vector.shape_cast %13 : vector<32x128xf32> to vector<1x32x128xf32>
      %cst = arith.constant dense<0.000000e+00> : vector<1xf32>
      %15 = vector.multi_reduction <add>, %14, %cst [1, 2] : vector<1x32x128xf32> to vector<1xf32>
      %16 = vector.shape_cast %15 : vector<1xf32> to vector<1x1x1xf32>
      %17 = vector.extract %16[0, 0, 0] : f32 from vector<1x1x1xf32>
      %c0_12 = arith.constant 0 : index
      %c0_13 = arith.constant 0 : index
      %18 = memref.load %arg4[%c0_12, %c0_13] : memref<1x1xf32, #tpu.memory_space<smem>>
      memref.store %17, %arg4[%c0_12, %c0_13] : memref<1x1xf32, #tpu.memory_space<smem>>
    } else {
    }
    return
  }
  func.func @transform_0(%arg0: i32, %arg1: i32) -> (i32, i32) {
    %c1_i32 = arith.constant 1 : i32
    %0 = arith.muli %arg0, %c1_i32 : i32
    %1 = arith.addi %0, %arg1 : i32
    %c0_i32 = arith.constant 0 : i32
    %2 = arith.minsi %1, %c0_i32 : i32
    %c0_i32_0 = arith.constant 0 : i32
    %c0_i32_1 = arith.constant 0 : i32
    return %2, %c0_i32_0 : i32, i32
  }
  func.func @transform_1(%arg0: i32, %arg1: i32) -> (i32, i32) {
    %c1_i32 = arith.constant 1 : i32
    %0 = arith.muli %arg0, %c1_i32 : i32
    %1 = arith.addi %0, %arg1 : i32
    %c0_i32 = arith.constant 0 : i32
    %2 = arith.minsi %1, %c0_i32 : i32
    %c0_i32_0 = arith.constant 0 : i32
    %c0_i32_1 = arith.constant 0 : i32
    return %2, %c0_i32_0 : i32, i32
  }
  func.func @transform_2(%arg0: i32, %arg1: i32) -> (i32, i32) {
    %c0_i32 = arith.constant 0 : i32
    %c0_i32_0 = arith.constant 0 : i32
    return %arg0, %c0_i32 : i32, i32
  }
}

</mosaic_0001>

<bundles_post_ra>
// kernel: tpu_custom_call.1
= control target key start
LH: loop header
LB: loop body
LE: loop exit
PB: predicated region body
PF: predicated region fallthrough
CT: control target
= control target key end

     0   :  { %7 = vsyncpa [#allocation4], 0  ;;  %s259_s0 = inlined_call_operand.hbm [shape: f32[32,128], index: 0, kind: input, shape index: {}]   ;;  %s260_s1 = inlined_call_operand.hbm [shape: f32[32,128], index: 1, kind: input, shape index: {}]   ;;  %s261_s2 = inlined_call_operand.hbm [shape: f32[1,1], index: 2, kind: output, shape index: {}]  }
   0x1   :  { %8 = vsyncpa [#allocation7], 0 }
   0x2   :  { %9 = vsyncpa [#allocation5], 0  ;;  %s203_s9 = smov [#allocation3]   ;;  %s143_s13 = scalar_lea.hbm %s259_s0, 512 }
   0x3   :  { %s21_s10 = sshll.u32 %s203_s9, 4  ;;  %p144_p0 = scmp.ne.s32.totalorder %s259_s0, %s143_s13  ;;  %s22_s10 = int_to_ptr.vmem [resolvable:$true] %s21_s10 }
   0x4   :  { %p147_p1 = scmp.lt.u32.totalorder %s143_s13, %s259_s0 }
   0x6   :  { %p149_p2 = pnand %p147_p1, %p144_p0 }
   0x8   :  { %152 = shalt.err (!%p149_p2)
}
   0x9   :  { %s153_s18 = scalar_lea.vmem %s22_s10, 512  ;;  %p158_p4 = scmp.lt.s32.totalorder %s22_s10, %s22_s10 }
   0xa   :  { %p154_p3 = scmp.ne.s32.totalorder %s22_s10, %s153_s18  ;;  %p159_p5 = scmp.lt.s32.totalorder %s153_s18, %s153_s18 }
   0xc   :  { %p160_p6 = por %p159_p5, %p158_p4 }
   0xe   :  { %p161_p7 = pnand %p160_p6, %p154_p3 }
  0x10   :  { %164 = shalt.err (!%p161_p7)
}
  0x11   :  { %s204_s19 = smov 128   ;;  %s205_s20 = smov 8  }
  0x12   :  { %27 = dma.hbm_to_vmem [thread:$0]  %s259_s0, 512, %s22_s10, [#allocation4], %s204_s19, %s204_s19, %s205_s20  }
  0x13   :  { %s206_s23 = smov [#allocation6]   ;;  %s165_s27 = scalar_lea.hbm %s260_s1, 512 }
  0x14   :  { %s39_s24 = sshll.u32 %s206_s23, 4  ;;  %p166_p8 = scmp.ne.s32.totalorder %s260_s1, %s165_s27  ;;  %s40_s24 = int_to_ptr.vmem [resolvable:$true] %s39_s24 }
  0x15   :  { %p169_p9 = scmp.lt.u32.totalorder %s165_s27, %s260_s1 }
  0x17   :  { %p171_p10 = pnand %p169_p9, %p166_p8 }
  0x19   :  { %174 = shalt.err (!%p171_p10)
}
  0x1a   :  { %s175_s4 = scalar_lea.vmem %s40_s24, 512  ;;  %p180_p12 = scmp.lt.s32.totalorder %s40_s24, %s40_s24 }
  0x1b   :  { %p176_p11 = scmp.ne.s32.totalorder %s40_s24, %s175_s4  ;;  %p181_p13 = scmp.lt.s32.totalorder %s175_s4, %s175_s4 }
  0x1d   :  { %p182_p0 = por %p181_p13, %p180_p12 }
  0x1f   :  { %p183_p1 = pnand %p182_p0, %p176_p11 }
  0x21   :  { %186 = shalt.err (!%p183_p1)
}
  0x22   :  { %45 = dma.hbm_to_vmem [thread:$0]  %s260_s1, 512, %s40_s24, [#allocation7], %s204_s19, %s204_s19, %s205_s20  }
  0x23   :  { %197 = dma.done.wait [#allocation4], 512  }
  0x24   :  { %198 = vsyncadd [#allocation4], 4294966784 }
  0x25   :  { %199 = dma.done.wait [#allocation7], 512  }
  0x26   :  { %200 = vsyncadd [#allocation7], 4294966784  ;;  %v68_v0 = vld [vmem:[#allocation3] sm:$0xff]  ;;  %v69_v1 = vld [vmem:[#allocation3 + $0x8] sm:$0xff]  ;;  %s187_s8 = scalar_lea.hbm %s261_s2, 16 }
  0x27   :  { %v70_v2 = vld [vmem:[#allocation3 + $0x10] sm:$0xff]  ;;  %v71_v3 = vld [vmem:[#allocation3 + $0x18] sm:$0xff]  ;;  %v72_v4 = vld [vmem:[#allocation6] sm:$0xff]  ;;  %p188_p2 = scmp.ne.s32.totalorder %s261_s2, %s187_s8  ;;  %p191_p3 = scmp.lt.u32.totalorder %s187_s8, %s261_s2 }
  0x28   :  { %v73_v5 = vld [vmem:[#allocation6 + $0x8] sm:$0xff]  ;;  %v74_v6 = vld [vmem:[#allocation6 + $0x10] sm:$0xff]  ;;  %v75_v7 = vld [vmem:[#allocation6 + $0x18] sm:$0xff]  ;;  %v76_v8 = vsub.f32 %v68_v0, %v72_v4 }
  0x29   :  { %v77_v9 = vsub.f32 %v69_v1, %v73_v5  ;;  %v78_v10 = vsub.f32 %v70_v2, %v74_v6  ;;  %v79_v11 = vsub.f32 %v71_v3, %v75_v7  ;;  %p193_p4 = pnand %p191_p3, %p188_p2 }
  0x2a   :  { %v84_v12 = vmul.f32 %v76_v8, %v76_v8 }
  0x2b   :  { %v85_v13 = vmul.f32 %v77_v9, %v77_v9  ;;  %v86_v14 = vmul.f32 %v78_v10, %v78_v10  ;;  %v87_v15 = vmul.f32 %v79_v11, %v79_v11 }
  0x2d   :  { %v103_v16 = vadd.f32 %v85_v13, %v84_v12 }
  0x2f   :  { %v104_v17 = vadd.f32 %v103_v16, %v86_v14 }
  0x31   :  { %v105_v18 = vadd.f32 %v104_v17, %v87_v15 }
  0x33   :  { %106 = vadd.xlane.f32.xlu0 %v105_v18 }
  0xc0   :  { %v107_v19 = vpop.xlane.xlu0 %106 }
  0xc1   :  { %v108_v20 = vrot.slane %v107_v19, 4 }
  0xc3   :  { %v109_v21 = vadd.f32 %v108_v20, %v107_v19 }
  0xc5   :  { %v110_v22 = vrot.slane %v109_v21, 2 }
  0xc7   :  { %v111_v23 = vadd.f32 %v110_v22, %v109_v21 }
  0xc9   :  { %v112_v24 = vrot.slane %v111_v23, 1 }
  0xcb   :  { %v113_v25 = vadd.f32 %v112_v24, %v111_v23 }
  0xcd   :  { %136 = vpush %v113_v25 }
  0xfe   :  { %s137_s1 = spop %136 }
  0xff   :  { %116 = sst [smem:[#allocation8]] %s137_s1 }
 0x100   :  { %196 = shalt.err (!%p193_p4)
}
 0x101   :  { %s207_s13 = smov [#allocation8]  }
 0x102   :  { %124 = dma.smem_to_hbm %s207_s13, 16, %s261_s2, [#allocation5]  }
 0x103   :  { %201 = dma.done.wait [#allocation5], 16  }
 0x104   :  { %202 = vsyncadd [#allocation5], 4294967280 }
 0x105   :  { %128 = sfence }
 0x106   :  { %129 = vsyncpa [#allocation4], 1 }
 0x107   :  { %130 = vsyncpa [#allocation7], 1 }
 0x108   :  { %131 = vsyncpa [#allocation5], 1 }

</bundles_post_ra>
